<compile_context>
chip_gen: v5e
topology: v5e:2x2
jax: 0.10.0
libtpu: 0.0.40
codegen_flags: <defaults>
</compile_context>

<pallas_src>
import functools

import jax
import jax.numpy as jnp
from jax.experimental import pallas as pl
from jax.experimental.pallas import tpu as pltpu

_NUM_CORE_SPLITS = 2              # v7x has 2 TensorCores; harmless (sequential) elsewhere
_TARGET_TILE_BYTES = 2 << 20      # ~2 MiB per-input block
_LANES = 128


def _masked_l1_kernel(pred_ref, gt_ref, sum_ref, cnt_ref, acc_sum, acc_cnt,
                      *, tr, rows, num_blocks, num_full_blocks,
                      steps_per_core, has_tail):
    c = pl.program_id(0)
    i = pl.program_id(1)

    @pl.when(i == 0)
    def _():
        acc_sum[...] = jnp.zeros_like(acc_sum)
        acc_cnt[...] = jnp.zeros_like(acc_cnt)

    blk = c * steps_per_core + i

    def accumulate(extra_mask=None):
        pred = pred_ref[...].astype(jnp.float32)   # (tr, 128)
        gt = gt_ref[...].astype(jnp.float32)       # (tr, 128)
        valid = (gt > 0.0) & (gt < 100.0)
        if extra_mask is not None:
            valid = valid & extra_mask
        masked = jnp.where(valid, jnp.abs(pred - gt), 0.0)
        # Sublane-only reshape (layout-free); reduce the leading vreg-chunk axis so
        # the resident accumulators stay a single (8, 128) vreg each.
        acc_sum[...] += jnp.sum(masked.reshape(tr // 8, 8, _LANES), axis=0)
        acc_cnt[...] += jnp.sum(
            valid.astype(jnp.int32).reshape(tr // 8, 8, _LANES), axis=0)

    # Steady state: full blocks need no row-bounds work at all.
    @pl.when(blk < num_full_blocks)
    def _():
        accumulate()

    if has_tail:
        # At most one ragged tail block in the whole grid: mask rows >= rows
        # (neutralizes the Pallas edge-block padding region).
        @pl.when((blk >= num_full_blocks) & (blk < num_blocks))
        def _():
            row_ids = blk * tr + jax.lax.broadcasted_iota(
                jnp.int32, (tr, _LANES), 0)
            accumulate(extra_mask=row_ids < rows)

    # Overshoot steps (blk >= num_blocks) from the 2-way core split fall through:
    # the clamped index_map keeps their DMA in-bounds and they add nothing.

    @pl.when(i == steps_per_core - 1)
    def _():
        sum_ref[...] = acc_sum[...].reshape(sum_ref.shape)
        cnt_ref[...] = acc_cnt[...].reshape(cnt_ref.shape)


def l1_masked_loss(depth_pred, depth_gt, *, target_tile_bytes=_TARGET_TILE_BYTES):
    """depth_pred: (N, 1, H, W); depth_gt: (N, H, W). Returns scalar f32 loss."""
    N, C, H, W = depth_pred.shape
    assert C == 1 and depth_gt.shape == (N, H, W)

    itemsize = jnp.dtype(depth_pred.dtype).itemsize
    # Sublane packing: 8 rows/vreg for 32-bit, 16 for bf16, 32 for 8-bit dtypes.
    row_align = max(8, 8 * (4 // max(1, itemsize)))

    total = N * H * W
    chunk = _LANES * row_align
    padded_total = ((total + chunk - 1) // chunk) * chunk

    # Contiguous flatten (free); pad once so the kernel is always lane-dense.
    pred_flat = depth_pred.reshape(total)
    gt_flat = depth_gt.reshape(total)
    if padded_total != total:
        pad = padded_total - total
        # gt pad = 0.0 -> invalid under the (gt > 0) mask, so padding adds nothing.
        pred_flat = jnp.pad(pred_flat, (0, pad))
        gt_flat = jnp.pad(gt_flat, (0, pad))

    rows = padded_total // _LANES
    pred2d = pred_flat.reshape(rows, _LANES)
    gt2d = gt_flat.reshape(rows, _LANES)

    tr = (target_tile_bytes // (_LANES * itemsize)) // row_align * row_align
    tr = max(row_align, tr)
    tr = min(tr, rows)

    num_blocks = -(-rows // tr)
    num_full_blocks = rows // tr
    has_tail = (rows % tr) != 0

    nc = _NUM_CORE_SPLITS
    steps = -(-num_blocks // nc)

    def in_map(c, i):
        # Clamp so overshoot steps re-read a valid block; the kernel skips them.
        return (jnp.minimum(c * steps + i, num_blocks - 1), 0)

    kernel = functools.partial(
        _masked_l1_kernel, tr=tr, rows=rows, num_blocks=num_blocks,
        num_full_blocks=num_full_blocks, steps_per_core=steps, has_tail=has_tail)

    # TODO(synk): confirm the leading "parallel" axis actually shards across v7x's
    # two TensorCores in the profile; switch to pltpu.CORE_PARALLEL if it does not.
    sum_out, cnt_out = pl.pallas_call(
        kernel,
        out_shape=(
            jax.ShapeDtypeStruct((nc, 8, _LANES), jnp.float32),
            jax.ShapeDtypeStruct((nc, 8, _LANES), jnp.int32),
        ),
        grid=(nc, steps),
        in_specs=[
            pl.BlockSpec((tr, _LANES), in_map),
            pl.BlockSpec((tr, _LANES), in_map),
        ],
        out_specs=(
            pl.BlockSpec((1, 8, _LANES), lambda c, i: (c, 0, 0)),
            pl.BlockSpec((1, 8, _LANES), lambda c, i: (c, 0, 0)),
        ),
        scratch_shapes=[
            pltpu.VMEM((8, _LANES), jnp.float32),   # running masked |diff| sum
            pltpu.VMEM((8, _LANES), jnp.int32),     # running valid count (exact)
        ],
        compiler_params=pltpu.CompilerParams(
            dimension_semantics=("parallel", "arbitrary"),
            vmem_limit_bytes=48 * 1024 * 1024,
        ),
    )(pred2d, gt2d)

    sum_total = jnp.sum(sum_out)
    cnt_total = jnp.sum(cnt_out)
    # 0 valid elements -> 0/0 = NaN, matching nn.L1Loss over an empty selection.
    return sum_total / cnt_total.astype(jnp.float32)


def _reference_loss(depth_pred, depth_gt):
    pred = depth_pred[:, 0, :, :].astype(jnp.float32)
    gt = depth_gt.astype(jnp.float32)
    valid = jnp.logical_and(gt > 0.0, gt < 100.0)
    diff = jnp.abs(pred - gt)
    return jnp.sum(jnp.where(valid, diff, 0.0)) / jnp.sum(valid.astype(jnp.float32))


if __name__ == "__main__":
    key = jax.random.PRNGKey(0)
    keys = jax.random.split(key, 10)

    def check(dp, dg, tol=1e-5, **kw):
        loss = jax.block_until_ready(l1_masked_loss(dp, dg, **kw))
        ref = _reference_loss(dp, dg)
        assert jnp.allclose(loss, ref, rtol=tol, atol=tol), (loss, ref)

    # 1) Small shape consistent with the module; lane padding (512 -> 1024), 1 block.
    N, H, W = 2, 16, 16
    dp = jax.random.uniform(keys[0], (N, 1, H, W), jnp.float32, 0.0, 50.0)
    dg = jax.random.uniform(keys[1], (N, H, W), jnp.float32, -20.0, 130.0)
    check(dp, dg)

    # 2) Non-multiple-of-128 spatial + tiny tile: pad path, 2 blocks, 2-core split.
    dp = jax.random.uniform(keys[2], (2, 1, 30, 30), jnp.float32, 0.0, 50.0)
    dg = jax.random.uniform(keys[3], (2, 30, 30), jnp.float32, -20.0, 130.0)
    check(dp, dg, target_tile_bytes=4096)

    # 3) Three full blocks on a 2-way split: exercises the clamped-overshoot skip.
    dp = jax.random.uniform(keys[4], (3, 1, 20, 100), jnp.float32, 0.0, 50.0)
    dg = jax.random.uniform(keys[5], (3, 20, 100), jnp.float32, -20.0, 130.0)
    check(dp, dg, target_tile_bytes=16 * 128 * 4)

    # 4) Ragged tail block (rows % tr != 0): exercises the gated row-bounds mask.
    dp = jax.random.uniform(keys[6], (1, 1, 25, 100), jnp.float32, 0.0, 50.0)
    dg = jax.random.uniform(keys[7], (1, 25, 100), jnp.float32, -20.0, 130.0)
    check(dp, dg, target_tile_bytes=16 * 128 * 4)

    # 5) bf16 inputs: 16-row alignment path, in-kernel upcast to f32.
    dp = jax.random.uniform(keys[8], (2, 1, 16, 64), jnp.float32, 0.0, 50.0
                            ).astype(jnp.bfloat16)
    dg = jax.random.uniform(keys[9], (2, 16, 64), jnp.float32, -20.0, 130.0
                            ).astype(jnp.bfloat16)
    check(dp, dg, tol=1e-4)

    print("KERNEL_OK")
</pallas_src>

<mosaic_0001>
module attributes {stable_mosaic.version = 11 : i64} {
  func.func @_masked_l1_kernel(%arg0: i32, %arg1: i32, %arg2: memref<8x128xf32, #tpu.memory_space<vmem>>, %arg3: memref<8x128xf32, #tpu.memory_space<vmem>>, %arg4: memref<1x8x128xf32, #tpu.memory_space<vmem>>, %arg5: memref<1x8x128xi32, #tpu.memory_space<vmem>>, %arg6: memref<8x128xf32, #tpu.memory_space<vmem>>, %arg7: memref<8x128xi32, #tpu.memory_space<vmem>>) attributes {dimension_semantics = [#tpu.dimension_semantics<parallel>, #tpu.dimension_semantics<arbitrary>], iteration_bounds = array<i64: 2, 1>, scalar_prefetch = 0 : i64, scratch_operands = 2 : i64, tpu.core_type = #tpu.core_type<tc>, window_params = [{transform_indices = @transform_0, window_bounds = array<i64: 8, 128>}, {transform_indices = @transform_1, window_bounds = array<i64: 8, 128>}, {transform_indices = @transform_2, window_bounds = array<i64: 1, 8, 128>}, {transform_indices = @transform_3, window_bounds = array<i64: 1, 8, 128>}]} {
    %c0_i32 = arith.constant 0 : i32
    %0 = arith.cmpi eq, %arg1, %c0_i32 : i32
    %1 = arith.extui %0 : i1 to i32
    %c0_i32_0 = arith.constant 0 : i32
    %2 = arith.cmpi ne, %1, %c0_i32_0 : i32
    scf.if %2 {
      %cst = arith.constant 0.000000e+00 : f32
      %11 = vector.broadcast %cst : f32 to vector<8x128xf32>
      %c0 = arith.constant 0 : index
      %c0_5 = arith.constant 0 : index
      %12 = vector.load %arg6[%c0, %c0_5] : memref<8x128xf32, #tpu.memory_space<vmem>>, vector<8x128xf32>
      tpu.vector_store %arg6[%c0, %c0_5], %11 {strides = array<i32>} : memref<8x128xf32, #tpu.memory_space<vmem>>, vector<8x128xf32>,
      %c0_i32_6 = arith.constant 0 : i32
      %13 = vector.broadcast %c0_i32_6 : i32 to vector<8x128xi32>
      %c0_7 = arith.constant 0 : index
      %c0_8 = arith.constant 0 : index
      %14 = vector.load %arg7[%c0_7, %c0_8] : memref<8x128xi32, #tpu.memory_space<vmem>>, vector<8x128xi32>
      tpu.vector_store %arg7[%c0_7, %c0_8], %13 {strides = array<i32>} : memref<8x128xi32, #tpu.memory_space<vmem>>, vector<8x128xi32>,
    } else {
    }
    %c1_i32 = arith.constant 1 : i32
    %3 = arith.muli %arg0, %c1_i32 : i32
    %4 = arith.addi %3, %arg1 : i32
    %c1_i32_1 = arith.constant 1 : i32
    %5 = arith.cmpi slt, %4, %c1_i32_1 : i32
    %6 = arith.extui %5 : i1 to i32
    %c0_i32_2 = arith.constant 0 : i32
    %7 = arith.cmpi ne, %6, %c0_i32_2 : i32
    scf.if %7 {
      %c0 = arith.constant 0 : index
      %c0_5 = arith.constant 0 : index
      %11 = vector.load %arg2[%c0, %c0_5] : memref<8x128xf32, #tpu.memory_space<vmem>>, vector<8x128xf32>
      %c0_6 = arith.constant 0 : index
      %c0_7 = arith.constant 0 : index
      %12 = vector.load %arg3[%c0_6, %c0_7] : memref<8x128xf32, #tpu.memory_space<vmem>>, vector<8x128xf32>
      %cst = arith.constant 0.000000e+00 : f32
      %13 = vector.broadcast %cst : f32 to vector<8x128xf32>
      %14 = arith.cmpf ogt, %12, %13 : vector<8x128xf32>
      %cst_8 = arith.constant 1.000000e+02 : f32
      %15 = vector.broadcast %cst_8 : f32 to vector<8x128xf32>
      %16 = arith.cmpf olt, %12, %15 : vector<8x128xf32>
      %17 = arith.andi %14, %16 : vector<8x128xi1>
      %18 = arith.subf %11, %12 : vector<8x128xf32>
      %19 = math.absf %18 : vector<8x128xf32>
      %cst_9 = arith.constant 0.000000e+00 : f32
      %20 = vector.broadcast %cst_9 : f32 to vector<8x128xf32>
      %21 = arith.select %17, %19, %20 : vector<8x128xi1>, vector<8x128xf32>
      %c0_10 = arith.constant 0 : index
      %c0_11 = arith.constant 0 : index
      %22 = vector.load %arg6[%c0_10, %c0_11] : memref<8x128xf32, #tpu.memory_space<vmem>>, vector<8x128xf32>
      %23 = vector.shape_cast %21 : vector<8x128xf32> to vector<1x8x128xf32>
      %cst_12 = arith.constant dense<0.000000e+00> : vector<8x128xf32>
      %24 = vector.multi_reduction <add>, %23, %cst_12 [0] : vector<1x8x128xf32> to vector<8x128xf32>
      %25 = arith.addf %22, %24 : vector<8x128xf32>
      %c0_13 = arith.constant 0 : index
      %c0_14 = arith.constant 0 : index
      %26 = vector.load %arg6[%c0_13, %c0_14] : memref<8x128xf32, #tpu.memory_space<vmem>>, vector<8x128xf32>
      tpu.vector_store %arg6[%c0_13, %c0_14], %25 {strides = array<i32>} : memref<8x128xf32, #tpu.memory_space<vmem>>, vector<8x128xf32>,
      %c0_15 = arith.constant 0 : index
      %c0_16 = arith.constant 0 : index
      %27 = vector.load %arg7[%c0_15, %c0_16] : memref<8x128xi32, #tpu.memory_space<vmem>>, vector<8x128xi32>
      %28 = arith.extui %17 : vector<8x128xi1> to vector<8x128xi32>
      %29 = vector.shape_cast %28 : vector<8x128xi32> to vector<1x8x128xi32>
      %cst_17 = arith.constant dense<0> : vector<8x128xi32>
      %30 = vector.multi_reduction <add>, %29, %cst_17 [0] : vector<1x8x128xi32> to vector<8x128xi32>
      %31 = arith.addi %27, %30 : vector<8x128xi32>
      %c0_18 = arith.constant 0 : index
      %c0_19 = arith.constant 0 : index
      %32 = vector.load %arg7[%c0_18, %c0_19] : memref<8x128xi32, #tpu.memory_space<vmem>>, vector<8x128xi32>
      tpu.vector_store %arg7[%c0_18, %c0_19], %31 {strides = array<i32>} : memref<8x128xi32, #tpu.memory_space<vmem>>, vector<8x128xi32>,
    } else {
    }
    %c0_i32_3 = arith.constant 0 : i32
    %8 = arith.cmpi eq, %arg1, %c0_i32_3 : i32
    %9 = arith.extui %8 : i1 to i32
    %c0_i32_4 = arith.constant 0 : i32
    %10 = arith.cmpi ne, %9, %c0_i32_4 : i32
    scf.if %10 {
      %c0 = arith.constant 0 : index
      %c0_5 = arith.constant 0 : index
      %11 = vector.load %arg6[%c0, %c0_5] : memref<8x128xf32, #tpu.memory_space<vmem>>, vector<8x128xf32>
      %12 = vector.shape_cast %11 : vector<8x128xf32> to vector<1x8x128xf32>
      %c0_6 = arith.constant 0 : index
      %c0_7 = arith.constant 0 : index
      %c0_8 = arith.constant 0 : index
      %13 = vector.load %arg4[%c0_6, %c0_7, %c0_8] : memref<1x8x128xf32, #tpu.memory_space<vmem>>, vector<1x8x128xf32>
      tpu.vector_store %arg4[%c0_6, %c0_7, %c0_8], %12 {strides = array<i32>} : memref<1x8x128xf32, #tpu.memory_space<vmem>>, vector<1x8x128xf32>,
      %c0_9 = arith.constant 0 : index
      %c0_10 = arith.constant 0 : index
      %14 = vector.load %arg7[%c0_9, %c0_10] : memref<8x128xi32, #tpu.memory_space<vmem>>, vector<8x128xi32>
      %15 = vector.shape_cast %14 : vector<8x128xi32> to vector<1x8x128xi32>
      %c0_11 = arith.constant 0 : index
      %c0_12 = arith.constant 0 : index
      %c0_13 = arith.constant 0 : index
      %16 = vector.load %arg5[%c0_11, %c0_12, %c0_13] : memref<1x8x128xi32, #tpu.memory_space<vmem>>, vector<1x8x128xi32>
      tpu.vector_store %arg5[%c0_11, %c0_12, %c0_13], %15 {strides = array<i32>} : memref<1x8x128xi32, #tpu.memory_space<vmem>>, vector<1x8x128xi32>,
    } else {
    }
    return
  }
  func.func @transform_0(%arg0: i32, %arg1: i32) -> (i32, i32) {
    %c1_i32 = arith.constant 1 : i32
    %0 = arith.muli %arg0, %c1_i32 : i32
    %1 = arith.addi %0, %arg1 : i32
    %c0_i32 = arith.constant 0 : i32
    %2 = arith.minsi %1, %c0_i32 : i32
    %c0_i32_0 = arith.constant 0 : i32
    %c0_i32_1 = arith.constant 0 : i32
    return %2, %c0_i32_0 : i32, i32
  }
  func.func @transform_1(%arg0: i32, %arg1: i32) -> (i32, i32) {
    %c1_i32 = arith.constant 1 : i32
    %0 = arith.muli %arg0, %c1_i32 : i32
    %1 = arith.addi %0, %arg1 : i32
    %c0_i32 = arith.constant 0 : i32
    %2 = arith.minsi %1, %c0_i32 : i32
    %c0_i32_0 = arith.constant 0 : i32
    %c0_i32_1 = arith.constant 0 : i32
    return %2, %c0_i32_0 : i32, i32
  }
  func.func @transform_2(%arg0: i32, %arg1: i32) -> (i32, i32, i32) {
    %c0_i32 = arith.constant 0 : i32
    %c0_i32_0 = arith.constant 0 : i32
    %c0_i32_1 = arith.constant 0 : i32
    return %arg0, %c0_i32, %c0_i32_0 : i32, i32, i32
  }
  func.func @transform_3(%arg0: i32, %arg1: i32) -> (i32, i32, i32) {
    %c0_i32 = arith.constant 0 : i32
    %c0_i32_0 = arith.constant 0 : i32
    %c0_i32_1 = arith.constant 0 : i32
    return %arg0, %c0_i32, %c0_i32_0 : i32, i32, i32
  }
}

</mosaic_0001>

<bundles_post_ra>
// kernel: tpu_custom_call.1
= control target key start
LH: loop header
LB: loop body
LE: loop exit
PB: predicated region body
PF: predicated region fallthrough
CT: control target
= control target key end

     0   :  { %9 = vsyncpa [#allocation5], 0  ;;  %s1013_s0 = inlined_call_operand.hbm [shape: f32[8,128], index: 0, kind: input, shape index: {}]   ;;  %s1014_s1 = inlined_call_operand.hbm [shape: f32[8,128], index: 1, kind: input, shape index: {}]   ;;  %s1015_s2 = inlined_call_operand.hbm [shape: f32[2,8,128], index: 2, kind: output, shape index: {0}]   ;;  %s1016_s3 = inlined_call_operand.hbm [shape: s32[2,8,128], index: 3, kind: output, shape index: {1}]  }
   0x1   :  { %11 = vsyncpa [#allocation5 + $0x1], 0 }
   0x2   :  { %12 = vsyncpa [#allocation8], 0 }
   0x3   :  { %14 = vsyncpa [#allocation8 + $0x1], 0 }
   0x4   :  { %15 = vsyncpa [#allocation6], 0 }
   0x5   :  { %17 = vsyncpa [#allocation6 + $0x1], 0 }
   0x6   :  { %18 = vsyncpa [#allocation11], 0 }
   0x7   :  { %20 = vsyncpa [#allocation11 + $0x1], 0  ;;  %s822_s12 = smov 0   ;;  %s824_s13 = smov 0  }
   0x8   :  { %s826_s14 = smov 0   ;;  %s828_s15 = smov 0  }
   0x9   :  { %s830_s16 = smov 0   ;;  %s832_s17 = smov 0  }
   0xa   :  { %s834_s18 = smov 0   ;;  %s836_s19 = smov 0  }
   0xb LB: > { %s477_s20 = sadd.s32 4294967295, %s795_s19   ;;  %s478_s21 = sadd.s32 4294967294, %s795_s19   ;;  %s795_s19 = sphi %s836_s19, %s26_s19   ;;  %s791_s18 = sphi %s834_s18, %s1028_s18   ;;  %s787_s17 = sphi %s832_s17, %s1027_s17   ;;  %s783_s16 = sphi %s830_s16, %s1003_s16   ;;  %s779_s15 = sphi %s828_s15, %s1026_s15   ;;  %s775_s14 = sphi %s826_s14, %s1025_s14   ;;  %s771_s13 = sphi %s824_s13, %s1024_s13   ;;  %s767_s12 = sphi %s822_s12, %s1023_s12  }
   0xc   : > { %s38_s22 = sadd.s32 1, %s791_s18  ;;  %p764_p1 = scmp.ne.s32.totalorder %s783_s16, 0 }
   0xd   : > { %p40_p0 = scmp.ge.s32.totalorder %s38_s22, 2  ;;  %p59_p2 = scmp.eq.s32.totalorder %s795_s19, 0 }
   0xe   : > { %p64_p3 = scmp.ne.s32.totalorder %s783_s16, %s779_s15  ;;  %p65_p5 = scmp.eq.s32.totalorder %s477_s20, 0 }
   0xf   : > { %s1030_s22 = smov (%p40_p0, %s38_s22), 0  ;;  %p868_p4 = por %p764_p1, %p59_p2 }
  0x10   : > { %p872_p6 = por %p65_p5, %p64_p3  ;;  %s106_s25 = ssub.s32 %s791_s18, %s1030_s22 }
  0x11   : > { %p107_p7 = scmp.eq.s32.totalorder %s106_s25, 0  ;;  %s109_s26 = sadd.s32 1, %s775_s14 }
  0x12   : > { %p119_p8 = scmp.ne.s32.totalorder %s775_s14, %s771_s13  ;;  %p120_p9 = scmp.eq.s32.totalorder %s477_s20, 1 }
  0x13   : > { %s880_s27 = scalar_select %p107_p7, %s775_s14, %s109_s26  }
  0x14   : > { %p125_p10 = scmp.ne.s32.totalorder %s771_s13, %s767_s12  ;;  %p126_p11 = scmp.eq.s32.totalorder %s478_s21, 1 }
  0x15   : > { %p886_p12 = por %p120_p9, %p119_p8  ;;  %p480_p13 = scmp.ge.s32.totalorder %s795_s19, 2 }
  0x16   : > { %p891_p0 = por %p126_p11, %p125_p10  ;;  %p519_p1 = scmp.lt.s32.totalorder %s795_s19, 2 }
  0x17   : > { %s185_s5 = sshll.u32 %s1013_s0, 4  ;;  %s797_s6 = smov [#allocation4]   ;;  %s186_s5 = int_to_ptr.hbm [resolvable:$true] %s185_s5 }
  0x18   : > { %s187_s7 = sshll.u32 %s797_s6, 4  ;;  %p901_p2 = pnand %p519_p1, %p868_p4  ;;  %s188_s7 = int_to_ptr.vmem [resolvable:$true] %s187_s7 }
  0x19   : > { %p485_p3 = scmp.ge.s32.totalorder %s795_s19, 1  ;;  %p214_p5 = scmp.lt.s32.totalorder %s795_s19, 3 }
  0x1a   : > { %s596_s9 = sshra.s32 %s186_s5, 4  ;;  %p600_p8 = pneg %p901_p2  ;;  %s597_s9 = int_to_ptr.hbm [resolvable:$true] %s596_s9 }
  0x1b   : > { %s598_s10 = scalar_lea.hbm %s597_s9, 8  ;;  %s603_s20 = scalar_lea.hbm %s1013_s0, 8 }
  0x1c   : > { %p599_p7 = scmp.ne.s32.totalorder %s597_s9, %s598_s10  ;;  %p605_p4 = scmp.lt.s32.totalorder %s603_s20, %s598_s10 }
  0x1e   : > { %p601_p9 = pnand %p600_p8, %p599_p7 }
  0x20   : > { %p602_p10 = pneg %p601_p9 }
  0x22   : > { %p607_p11 = pnand %p605_p4, %p602_p10 }
  0x24   : > { %610 = shalt.err (!%p607_p11)
}
  0x25   : > { %508 = dma.hbm_to_vmem [thread:$0]  (!%p901_p2), %s186_s5, 128, %s188_s7, [#allocation5]  }
  0x26   : > { %p921_p1 = pnand %p485_p3, %p214_p5  ;;  %s207_s26 = sshll.u32 %s1014_s1, 4  ;;  %s208_s26 = int_to_ptr.hbm [resolvable:$true] %s207_s26 }
  0x27   : > { %s798_s30 = smov [#allocation7]   ;;  %s626_s6 = sshra.s32 %s208_s26, 4  ;;  %s627_s6 = int_to_ptr.hbm [resolvable:$true] %s626_s6 }
  0x28   : > { %s209_s4 = sshll.u32 %s798_s30, 4  ;;  %s628_s9 = scalar_lea.hbm %s627_s6, 8  ;;  %s210_s4 = int_to_ptr.vmem [resolvable:$true] %s209_s4 }
  0x29   : > { %p629_p7 = scmp.ne.s32.totalorder %s627_s6, %s628_s9  ;;  %s633_s10 = scalar_lea.hbm %s1014_s1, 8 }
  0x2a   : > { %p635_p3 = scmp.lt.s32.totalorder %s633_s10, %s628_s9 }
  0x2b   : > { %p631_p9 = pnand %p629_p7, %p600_p8 }
  0x2d   : > { %p632_p10 = pneg %p631_p9 }
  0x2f   : > { %p637_p5 = pnand %p635_p3, %p632_p10 }
  0x31   : > { %640 = shalt.err (!%p637_p5)
}
  0x32   : > { %511 = dma.hbm_to_vmem [thread:$0]  (!%p901_p2), %s208_s26, 128, %s210_s4, [#allocation8]  }
  0x33   : > { %218 = sbr.rel (%p921_p1) target bundleno = 105 (0x69), region = 28  ;;  %s220_s11 = sand.u32 (!%p921_p1), 1, %s783_s16  }
  0x34   : > { %s486_s15 = sshll.u32 (!%p921_p1), %s220_s11, 3  ;;  %s221_s20 = scalar_lea.sflag (!%p921_p1), [#allocation5], %s220_s11 }
  0x35   : > { %s224_s23 = scalar_lea.vmem (!%p921_p1), [#allocation4], %s486_s15 }
  0x38   : > { %749 = dma.done.wait (%p872_p6), %s221_s20, 128  }
  0x39   : > { %751 = vsyncadd (%p872_p6), %s221_s20, 4294967168  ;;  %s231_s25 = scalar_lea.sflag [#allocation8], %s220_s11  ;;  %s234_s30 = scalar_lea.vmem [#allocation7], %s486_s15 }
  0x3a   : > { %753 = dma.done.wait (%p872_p6), %s231_s25, 128  }
  0x3b   : > { %755 = vsyncadd (%p872_p6), %s231_s25, 4294967168  ;;  %s948_s8 = sand.u32 1, %s771_s13   ;;  %v799_v0 = vmov 0.0   ;;  %v800_v1 = vmov 0   ;;  %p490_p2 = scmp.ge.s32.totalorder %s787_s17, 1 }
  0x3c   : > { %s488_s21 = sshll.u32 %s948_s8, 3  ;;  %278 = vst [vmem:[#allocation2] sm:$0xff] %v799_v0 }
  0x3d   : > { %279 = vst [vmem:[#allocation3] sm:$0xff] %v800_v1  ;;  %s260_s26 = scalar_lea.vmem [#allocation9], %s488_s21  ;;  %s951_s4 = scalar_lea.vmem [#allocation10], %s488_s21 }
  0x3e   : > { %284 = sbr.rel (%p490_p2) target bundleno = 76 (0x4c), region = 44 }
  0x43   : > { %v285_v2 = vld [vmem:[%s224_s23] sm:$0xff]  ;;  %v286_v3 = vld [vmem:[%s234_s30] sm:$0xff]  ;;  %v801_v8 = vmov 0  }
  0x44   : > { %vm287_vm0 = vcmp.gt.f32.partialorder %v286_v3, 0.0  ;;  %vm288_vm1 = vcmp.lt.f32.partialorder %v286_v3, 100.0  ;;  %v290_v4 = vsub.f32 %v285_v2, %v286_v3  ;;  %v297_v5 = vld [vmem:[#allocation3] sm:$0xff]  ;;  %v293_v7 = vld [vmem:[#allocation2] sm:$0xff] }
  0x45   : > { %vm289_vm2 = vmand %vm287_vm0, %vm288_vm1 }
  0x46   : > { %v291_v6 = vand.u32 2147483647, %v290_v4  ;;  %v298_v9 = vsel %vm289_vm2, 1, %v801_v8 }
  0x47   : > { %v299_v10 = vadd.s32 %v298_v9, %v297_v5 }
  0x48   : > { %v292_v11 = vsel %vm289_vm2, %v291_v6, 0.0 }
  0x49   : > { %v295_v12 = vadd.f32 %v293_v7, %v292_v11  ;;  %300 = vst [vmem:[#allocation3] sm:$0xff] %v299_v10 }
  0x4b   : > { %296 = vst [vmem:[#allocation2] sm:$0xff] %v295_v12 }
  0x4c PF: > { %s493_s24 = sshll.u32 %s787_s17, 3  ;;  %s326_s7 = sshll.u32 %s260_s26, 4  ;;  %s327_s7 = int_to_ptr.vmem [resolvable:$true] %s326_s7 }
  0x4d   : > { %s324_s5 = scalar_lea.hbm %s1015_s2, %s493_s24  ;;  %s309_s11 = scalar_lea.sflag [#allocation6], %s948_s8 }
  0x4e   : > { %s328_s10 = sshll.u32 %s324_s5, 4  ;;  %s676_s25 = scalar_lea.hbm %s1015_s2, 16  ;;  %s329_s10 = int_to_ptr.hbm [resolvable:$true] %s328_s10 }
  0x4f   : > { %s670_s15 = sshra.s32 %s329_s10, 4  ;;  %s671_s15 = int_to_ptr.hbm [resolvable:$true] %s670_s15 }
  0x50   : > { %v306_v14 = vld [vmem:[#allocation3] sm:$0xff]  ;;  %s672_s20 = scalar_lea.hbm %s671_s15, 8  ;;  %p677_p11 = scmp.lt.s32.totalorder %s671_s15, %s1015_s2 }
  0x51   : > { %307 = vst [vmem:[%s951_s4] sm:$0xff] %v306_v14  ;;  %p673_p6 = scmp.ne.s32.totalorder %s671_s15, %s672_s20  ;;  %p678_p1 = scmp.lt.s32.totalorder %s676_s25, %s672_s20 }
  0x52   : > { %v304_v13 = vld [vmem:[#allocation2] sm:$0xff] }
  0x53   : > { %305 = vst [vmem:[%s260_s26] sm:$0xff] %v304_v13  ;;  %p674_p8 = pnand %p673_p6, %p886_p12  ;;  %p679_p7 = por %p678_p1, %p677_p11 }
  0x55   : > { %p675_p4 = pneg %p674_p8 }
  0x57   : > { %p680_p9 = pnand %p679_p7, %p675_p4 }
  0x59   : > { %683 = shalt.err (!%p680_p9)
}
  0x5a   : > { %501 = dma.vmem_to_hbm [thread:$0]  (%p886_p12), %s327_s7, 128, %s329_s10, %s309_s11  }
  0x5b   : > { %s338_s9 = scalar_lea.hbm %s1016_s3, %s493_s24  ;;  %s340_s5 = sshll.u32 %s951_s4, 4  ;;  %s341_s5 = int_to_ptr.vmem [resolvable:$true] %s340_s5 }
  0x5c   : > { %s342_s23 = sshll.u32 %s338_s9, 4  ;;  %s314_s17 = scalar_lea.sflag [#allocation11], %s948_s8  ;;  %s343_s23 = int_to_ptr.hbm [resolvable:$true] %s342_s23 }
  0x5d   : > { %s698_s15 = sshra.s32 %s343_s23, 4  ;;  %s704_s7 = scalar_lea.hbm %s1016_s3, 16  ;;  %s699_s15 = int_to_ptr.hbm [resolvable:$true] %s698_s15 }
  0x5e   : > { %s700_s20 = scalar_lea.hbm %s699_s15, 8  ;;  %p705_p2 = scmp.lt.s32.totalorder %s699_s15, %s1016_s3 }
  0x5f   : > { %p701_p10 = scmp.ne.s32.totalorder %s699_s15, %s700_s20  ;;  %p706_p6 = scmp.lt.s32.totalorder %s704_s7, %s700_s20 }
  0x61   : > { %p702_p3 = pnand %p701_p10, %p886_p12  ;;  %p707_p8 = por %p706_p6, %p705_p2 }
  0x63   : > { %p703_p5 = pneg %p702_p3 }
  0x65   : > { %p708_p4 = pnand %p707_p8, %p703_p5 }
  0x67   : > { %711 = shalt.err (!%p708_p4)
}
  0x68   : > { %502 = dma.vmem_to_hbm [thread:$0]  (%p886_p12), %s341_s5, 128, %s343_s23, %s314_s17  }
  0x69 PF: > { %s354_s8 = sand.u32 1, %s767_s12   ;;  %p513_p11 = pnand %p480_p13, %p891_p0 }
  0x6a   : > { %s355_s4 = scalar_lea.sflag [#allocation6], %s354_s8 }
  0x6b   : > { %p514_p1 = pneg %p513_p11 }
  0x6d   : > { %757 = dma.done.wait (%p514_p1), %s355_s4, 128  }
  0x6e   : > { %759 = vsyncadd (%p514_p1), %s355_s4, 4294967168  ;;  %s365_s24 = scalar_lea.sflag [#allocation11], %s354_s8 }
  0x6f   : > { %761 = dma.done.wait (%p514_p1), %s365_s24, 128  }
  0x70   : > { %763 = vsyncadd (%p514_p1), %s365_s24, 4294967168  ;;  %s26_s19 = sadd.s32 1, %s795_s19   ;;  %s1023_s12 = smov %s771_s13 }
  0x71   : > { %p23_p7 = scmp.ge.s32.totalorder %s26_s19, 4   ;;  %s1024_s13 = smov %s775_s14 }
  0x72   : > { %s1025_s14 = smov %s880_s27  ;;  %s1026_s15 = smov %s783_s16 }
  0x73   : > { %s1003_s16 = smov 0   ;;  %s1027_s17 = smov %s791_s18 }
  0x74   : > { %s1028_s18 = smov %s1030_s22  ;;  %25 = sbr.rel (!%p23_p7) target bundleno = 11 (0xb), region = 115 }
  0x79   :  { %371 = vsyncpa [#allocation5], 1 }
  0x7a   :  { %373 = vsyncpa [#allocation5 + $0x1], 1 }
  0x7b   :  { %374 = vsyncpa [#allocation8], 1 }
  0x7c   :  { %376 = vsyncpa [#allocation8 + $0x1], 1 }
  0x7d   :  { %377 = vsyncpa [#allocation6], 1 }
  0x7e   :  { %379 = vsyncpa [#allocation6 + $0x1], 1 }
  0x7f   :  { %380 = vsyncpa [#allocation11], 1 }
  0x80   :  { %382 = vsyncpa [#allocation11 + $0x1], 1 }

</bundles_post_ra>
